<compile_context>
chip_gen: v7x
topology: tpu7x:2x2x1
jax: 0.10.0
libtpu: 0.0.40
codegen_flags: <defaults>
</compile_context>

<pallas_src>
import functools
import math

import jax
import jax.numpy as jnp
from jax import lax
from jax.experimental import pallas as pl
from jax.experimental.pallas import tpu as pltpu

_LANE = 128
_MAX_TILE = 32768            # raised cap; real limit is the VMEM budget / H*W
_PIO2 = 1.5707963267948966
_PI = 3.141592653589793


def _vmem_budgets():
    """Returns (input+scratch byte budget, scoped vmem_limit_bytes), per chip gen."""
    try:
        cap = pltpu.get_tpu_info().vmem_capacity_bytes
    except Exception:
        cap = 64 << 20
    if cap >= (96 << 20):     # v5e / v6e: 128 MiB physical VMEM
        limit = 64 << 20
    else:                     # v7x: 64 MiB physical VMEM
        limit = 44 << 20
    return (limit * 3) // 4, limit


def _pick_tile(n, c, hw, itemsize, input_budget, max_lane_tile):
    """Largest lane tile (multiple of 128) s.t. 2 inputs x 2 pipeline buffers of
    (N, C, TILE) in the native dtype plus the (N, TILE) f32 accumulator scratch
    fit the VMEM budget."""
    hw128 = -(-hw // _LANE) * _LANE
    per_lane = 2 * 2 * n * c * itemsize + 4 * n
    tile = (input_budget // per_lane) // _LANE * _LANE
    tile = min(tile, _MAX_TILE, hw128)
    if max_lane_tile is not None:
        tile = min(tile, max(_LANE, (max_lane_tile // _LANE) * _LANE))
    return max(tile, _LANE)


def _asin_poly(x):
    """Cephes asinf core: asin(x) for |x| <= 0.5 (f32 minimax polynomial)."""
    z = x * x
    p = jnp.float32(4.2163199048e-2)
    p = p * z + jnp.float32(2.4181311049e-2)
    p = p * z + jnp.float32(4.5470025998e-2)
    p = p * z + jnp.float32(7.4953002686e-2)
    p = p * z + jnp.float32(1.6666752422e-1)
    return x + x * z * p


def _acos_f32(x):
    """float32 arccos for x in [-1, 1]; mul/add/cmp/select/sqrt only.
    Single Horner chain shared by both branches."""
    a = jnp.abs(x)
    big_branch = a > 0.5
    s = jnp.sqrt(jnp.maximum(0.5 * (1.0 - a), 0.0))
    arg = jnp.where(big_branch, s, x)
    p = _asin_poly(arg)
    small = _PIO2 - p                                  # |x| <= 0.5
    big_pos = 2.0 * p                                  # 0.5 < x <= 1
    big = jnp.where(x < 0.0, _PI - big_pos, big_pos)   # -1 <= x < -0.5
    return jnp.where(big_branch, big, small)


def _sam_kernel(o_ref, l_ref, out_ref, acc_ref, *, tile, tiles_per_part, hw):
    # o_ref, l_ref: (N, C, TILE) native dtype; out_ref: (1, N, 1) f32;
    # acc_ref: (N, TILE) f32 VMEM scratch (per-partition running sum).
    p = pl.program_id(0)
    j = pl.program_id(1)

    @pl.when(j == 0)
    def _():
        acc_ref[...] = jnp.zeros_like(acc_ref)

    o = o_ref[...].astype(jnp.float32)
    l = l_ref[...].astype(jnp.float32)
    norm_o = jnp.sum(o * o, axis=1)          # (N, TILE)
    norm_l = jnp.sum(l * l, axis=1)          # (N, TILE)
    sp = jnp.sum(o * l, axis=1)              # (N, TILE)

    nsq = norm_o * norm_l
    # Exact sqrt + divide (matches torch's sp / sqrt(no*nl) behaviour near |cos|=1
    # better than an approximate rsqrt).
    ratio = sp / jnp.sqrt(nsq)

    # Global lane index mask: handles the ragged spatial tail of the last block
    # and any clamped duplicate block (no wrapper-side padding anymore).
    base = (p * tiles_per_part + j) * tile
    lane = lax.broadcasted_iota(jnp.int32, norm_o.shape, 1)
    in_bounds = (base + lane) < hw

    # torch path: norm_p==0 -> NaN, |ratio|>1 -> acos NaN; both dropped by nansum.
    valid = in_bounds & (nsq > 0.0) & (jnp.abs(ratio) <= 1.0)
    ang = _acos_f32(jnp.clip(ratio, -1.0, 1.0))
    acc_ref[...] += jnp.where(valid, ang, jnp.float32(0.0))

    @pl.when(j == pl.num_programs(1) - 1)
    def _():
        out_ref[...] = jnp.sum(acc_ref[...], axis=1, keepdims=True).reshape(out_ref.shape)


def sam(outputs, labels, max_lane_tile=None):
    """SAM forward. outputs/labels: (N, C, H, W) -> (N,) mean angle in degrees."""
    N, C, H, W = outputs.shape
    HW = H * W

    # Pure reshapes (no copy); keep native dtype so HBM traffic stays minimal.
    o = outputs.reshape(N, C, HW)
    l = labels.reshape(N, C, HW)
    itemsize = max(o.dtype.itemsize, l.dtype.itemsize)

    input_budget, vmem_limit = _vmem_budgets()
    tile = _pick_tile(N, C, HW, itemsize, input_budget, max_lane_tile)
    num_tiles = -(-HW // tile)

    # Leading parallel partition axis: sharded across TensorCores on v7x
    # (megacore); harmless sequential split on single-core v5e/v6e.
    P = 2 if num_tiles >= 2 else 1
    tpp = -(-num_tiles // P)

    def in_map(p, j):
        # Clamp to the last real tile; clamped duplicates are fully masked
        # in-kernel by the global lane-index test.
        return (0, 0, jnp.minimum(p * tpp + j, num_tiles - 1))

    kernel = functools.partial(_sam_kernel, tile=tile, tiles_per_part=tpp, hw=HW)

    partial_sums = pl.pallas_call(
        kernel,
        out_shape=jax.ShapeDtypeStruct((P, N, 1), jnp.float32),
        grid_spec=pltpu.PrefetchScalarGridSpec(
            num_scalar_prefetch=0,
            grid=(P, tpp),
            in_specs=[
                pl.BlockSpec((N, C, tile), in_map),
                pl.BlockSpec((N, C, tile), in_map),
            ],
            out_specs=pl.BlockSpec((1, N, 1), lambda p, j: (p, 0, 0)),
            scratch_shapes=[pltpu.VMEM((N, tile), jnp.float32)],
        ),
        compiler_params=pltpu.CompilerParams(
            dimension_semantics=("parallel", "arbitrary"),
            vmem_limit_bytes=vmem_limit,
        ),
    )(o, l)

    scale = (180.0 / math.pi) / HW
    return jnp.sum(partial_sums[:, :, 0], axis=0) * scale


def _sam_ref(outputs, labels):
    """Pure-JAX reference mirroring the torch code exactly."""
    outputs = outputs.astype(jnp.float32)
    labels = labels.astype(jnp.float32)
    no = jnp.sum(outputs * outputs, axis=1)
    nl = jnp.sum(labels * labels, axis=1)
    sp = jnp.sum(outputs * labels, axis=1)
    npd = jnp.sqrt(no * nl)
    sp = jnp.where(npd == 0.0, jnp.nan, sp)
    npd = jnp.where(npd == 0.0, jnp.nan, npd)
    N = outputs.shape[0]
    HW = npd.shape[1] * npd.shape[2]
    sp = sp.reshape(N, HW)
    npd = npd.reshape(N, HW)
    ang = jnp.arccos(sp / npd)
    return jnp.nansum(ang, axis=1) / HW * (180.0 / jnp.pi)


if __name__ == "__main__":
    key = jax.random.PRNGKey(0)
    k1, k2 = jax.random.split(key)
    N, C, H, W = 2, 4, 16, 16
    outputs = jax.random.normal(k1, (N, C, H, W), dtype=jnp.float32)
    labels = jax.random.normal(k2, (N, C, H, W), dtype=jnp.float32)
    # Exercise the norm_product == 0 -> NaN -> nansum path: zero out one pixel's
    # label vector across all channels.
    labels = labels.at[:, :, 0, 0].set(0.0)

    angle = jax.block_until_ready(sam(outputs, labels))
    angle_ref = jax.block_until_ready(_sam_ref(outputs, labels))
    assert angle.shape == (N,)
    assert jnp.allclose(angle, angle_ref, rtol=1e-4, atol=1e-4), (angle, angle_ref)

    # Multi-tile path (forces the parallel partition axis) on the same data.
    angle_b = jax.block_until_ready(sam(outputs, labels, max_lane_tile=128))
    assert jnp.allclose(angle_b, angle_ref, rtol=1e-4, atol=1e-4), (angle_b, angle_ref)

    # Ragged spatial tail (HW=300 not a multiple of 128) + clamped duplicate
    # block + native-bf16 streaming path.
    H2, W2 = 20, 15
    out2 = jax.random.normal(k1, (N, C, H2, W2), dtype=jnp.bfloat16)
    lab2 = jax.random.normal(k2, (N, C, H2, W2), dtype=jnp.bfloat16)
    angle2 = jax.block_until_ready(sam(out2, lab2, max_lane_tile=128))
    angle2_ref = jax.block_until_ready(_sam_ref(out2, lab2))
    assert jnp.allclose(angle2, angle2_ref, rtol=3e-3, atol=3e-3), (angle2, angle2_ref)

    print("KERNEL_OK")
</pallas_src>

<mosaic_0001>
module attributes {stable_mosaic.version = 11 : i64} {
  func.func @_sam_kernel(%arg0: i32, %arg1: i32, %arg2: memref<2x4x256xf32, #tpu.memory_space<vmem>>, %arg3: memref<2x4x256xf32, #tpu.memory_space<vmem>>, %arg4: memref<1x2x1xf32, #tpu.memory_space<vmem>>, %arg5: memref<2x256xf32, #tpu.memory_space<vmem>>) attributes {dimension_semantics = [#tpu.dimension_semantics<parallel>, #tpu.dimension_semantics<arbitrary>], iteration_bounds = array<i64: 1, 1>, scalar_prefetch = 0 : i64, scratch_operands = 1 : i64, tpu.core_type = #tpu.core_type<tc>, window_params = [{transform_indices = @transform_0, window_bounds = array<i64: 2, 4, 256>}, {transform_indices = @transform_1, window_bounds = array<i64: 2, 4, 256>}, {transform_indices = @transform_2, window_bounds = array<i64: 1, 2, 1>}]} {
    %c0_i32 = arith.constant 0 : i32
    %0 = arith.cmpi eq, %arg1, %c0_i32 : i32
    %1 = arith.extui %0 : i1 to i32
    %c0_i32_0 = arith.constant 0 : i32
    %2 = arith.cmpi ne, %1, %c0_i32_0 : i32
    scf.if %2 {
      %cst_33 = arith.constant 0.000000e+00 : f32
      %79 = vector.broadcast %cst_33 : f32 to vector<2x256xf32>
      %c0_34 = arith.constant 0 : index
      %c0_35 = arith.constant 0 : index
      %80 = vector.load %arg5[%c0_34, %c0_35] : memref<2x256xf32, #tpu.memory_space<vmem>>, vector<2x256xf32>
      tpu.vector_store %arg5[%c0_34, %c0_35], %79 {strides = array<i32>} : memref<2x256xf32, #tpu.memory_space<vmem>>, vector<2x256xf32>,
    } else {
    }
    %c0 = arith.constant 0 : index
    %c0_1 = arith.constant 0 : index
    %c0_2 = arith.constant 0 : index
    %3 = vector.load %arg2[%c0, %c0_1, %c0_2] : memref<2x4x256xf32, #tpu.memory_space<vmem>>, vector<2x4x256xf32>
    %c0_3 = arith.constant 0 : index
    %c0_4 = arith.constant 0 : index
    %c0_5 = arith.constant 0 : index
    %4 = vector.load %arg3[%c0_3, %c0_4, %c0_5] : memref<2x4x256xf32, #tpu.memory_space<vmem>>, vector<2x4x256xf32>
    %5 = arith.mulf %3, %3 : vector<2x4x256xf32>
    %cst = arith.constant dense<0.000000e+00> : vector<2x256xf32>
    %6 = vector.multi_reduction <add>, %5, %cst [1] : vector<2x4x256xf32> to vector<2x256xf32>
    %7 = arith.mulf %4, %4 : vector<2x4x256xf32>
    %cst_6 = arith.constant dense<0.000000e+00> : vector<2x256xf32>
    %8 = vector.multi_reduction <add>, %7, %cst_6 [1] : vector<2x4x256xf32> to vector<2x256xf32>
    %9 = arith.mulf %3, %4 : vector<2x4x256xf32>
    %cst_7 = arith.constant dense<0.000000e+00> : vector<2x256xf32>
    %10 = vector.multi_reduction <add>, %9, %cst_7 [1] : vector<2x4x256xf32> to vector<2x256xf32>
    %11 = arith.mulf %6, %8 : vector<2x256xf32>
    %12 = math.sqrt %11 : vector<2x256xf32>
    %13 = arith.divf %10, %12 : vector<2x256xf32>
    %c1_i32 = arith.constant 1 : i32
    %14 = arith.muli %arg0, %c1_i32 : i32
    %15 = arith.addi %14, %arg1 : i32
    %c256_i32 = arith.constant 256 : i32
    %16 = arith.muli %15, %c256_i32 : i32
    %17 = tpu.iota {dimensions = array<i32: 1>} : vector<2x256xi32>
    %18 = vector.broadcast %16 : i32 to vector<2x256xi32>
    %19 = arith.addi %18, %17 : vector<2x256xi32>
    %c256_i32_8 = arith.constant 256 : i32
    %20 = vector.broadcast %c256_i32_8 : i32 to vector<2x256xi32>
    %21 = arith.cmpi slt, %19, %20 : vector<2x256xi32>
    %cst_9 = arith.constant 0.000000e+00 : f32
    %22 = vector.broadcast %cst_9 : f32 to vector<2x256xf32>
    %23 = arith.cmpf ogt, %11, %22 : vector<2x256xf32>
    %24 = arith.andi %21, %23 : vector<2x256xi1>
    %25 = math.absf %13 : vector<2x256xf32>
    %cst_10 = arith.constant 1.000000e+00 : f32
    %26 = vector.broadcast %cst_10 : f32 to vector<2x256xf32>
    %27 = arith.cmpf ole, %25, %26 : vector<2x256xf32>
    %28 = arith.andi %24, %27 : vector<2x256xi1>
    %cst_11 = arith.constant -1.000000e+00 : f32
    %cst_12 = arith.constant 1.000000e+00 : f32
    %29 = vector.broadcast %cst_11 : f32 to vector<2x256xf32>
    %30 = arith.maximumf %29, %13 : vector<2x256xf32>
    %31 = vector.broadcast %cst_12 : f32 to vector<2x256xf32>
    %32 = arith.minimumf %31, %30 : vector<2x256xf32>
    %33 = math.absf %32 : vector<2x256xf32>
    %cst_13 = arith.constant 5.000000e-01 : f32
    %34 = vector.broadcast %cst_13 : f32 to vector<2x256xf32>
    %35 = arith.cmpf ogt, %33, %34 : vector<2x256xf32>
    %cst_14 = arith.constant 1.000000e+00 : f32
    %36 = vector.broadcast %cst_14 : f32 to vector<2x256xf32>
    %37 = arith.subf %36, %33 : vector<2x256xf32>
    %cst_15 = arith.constant 5.000000e-01 : f32
    %38 = vector.broadcast %cst_15 : f32 to vector<2x256xf32>
    %39 = arith.mulf %38, %37 : vector<2x256xf32>
    %cst_16 = arith.constant 0.000000e+00 : f32
    %40 = vector.broadcast %cst_16 : f32 to vector<2x256xf32>
    %41 = arith.maximumf %39, %40 : vector<2x256xf32>
    %42 = math.sqrt %41 : vector<2x256xf32>
    %43 = arith.select %35, %42, %32 : vector<2x256xi1>, vector<2x256xf32>
    %44 = arith.mulf %43, %43 : vector<2x256xf32>
    %cst_17 = arith.constant 4.216320e-02 : f32
    %45 = vector.broadcast %cst_17 : f32 to vector<2x256xf32>
    %46 = arith.mulf %45, %44 : vector<2x256xf32>
    %cst_18 = arith.constant 0.024181312 : f32
    %47 = vector.broadcast %cst_18 : f32 to vector<2x256xf32>
    %48 = arith.addf %46, %47 : vector<2x256xf32>
    %49 = arith.mulf %48, %44 : vector<2x256xf32>
    %cst_19 = arith.constant 0.0454700254 : f32
    %50 = vector.broadcast %cst_19 : f32 to vector<2x256xf32>
    %51 = arith.addf %49, %50 : vector<2x256xf32>
    %52 = arith.mulf %51, %44 : vector<2x256xf32>
    %cst_20 = arith.constant 0.0749530047 : f32
    %53 = vector.broadcast %cst_20 : f32 to vector<2x256xf32>
    %54 = arith.addf %52, %53 : vector<2x256xf32>
    %55 = arith.mulf %54, %44 : vector<2x256xf32>
    %cst_21 = arith.constant 0.166667521 : f32
    %56 = vector.broadcast %cst_21 : f32 to vector<2x256xf32>
    %57 = arith.addf %55, %56 : vector<2x256xf32>
    %58 = arith.mulf %43, %44 : vector<2x256xf32>
    %59 = arith.mulf %58, %57 : vector<2x256xf32>
    %60 = arith.addf %43, %59 : vector<2x256xf32>
    %cst_22 = arith.constant 1.57079637 : f32
    %61 = vector.broadcast %cst_22 : f32 to vector<2x256xf32>
    %62 = arith.subf %61, %60 : vector<2x256xf32>
    %cst_23 = arith.constant 2.000000e+00 : f32
    %63 = vector.broadcast %cst_23 : f32 to vector<2x256xf32>
    %64 = arith.mulf %63, %60 : vector<2x256xf32>
    %cst_24 = arith.constant 0.000000e+00 : f32
    %65 = vector.broadcast %cst_24 : f32 to vector<2x256xf32>
    %66 = arith.cmpf olt, %32, %65 : vector<2x256xf32>
    %cst_25 = arith.constant 3.14159274 : f32
    %67 = vector.broadcast %cst_25 : f32 to vector<2x256xf32>
    %68 = arith.subf %67, %64 : vector<2x256xf32>
    %69 = arith.select %66, %68, %64 : vector<2x256xi1>, vector<2x256xf32>
    %70 = arith.select %35, %69, %62 : vector<2x256xi1>, vector<2x256xf32>
    %c0_26 = arith.constant 0 : index
    %c0_27 = arith.constant 0 : index
    %71 = vector.load %arg5[%c0_26, %c0_27] : memref<2x256xf32, #tpu.memory_space<vmem>>, vector<2x256xf32>
    %cst_28 = arith.constant 0.000000e+00 : f32
    %72 = vector.broadcast %cst_28 : f32 to vector<2x256xf32>
    %73 = arith.select %28, %70, %72 : vector<2x256xi1>, vector<2x256xf32>
    %74 = arith.addf %71, %73 : vector<2x256xf32>
    %c0_29 = arith.constant 0 : index
    %c0_30 = arith.constant 0 : index
    %75 = vector.load %arg5[%c0_29, %c0_30] : memref<2x256xf32, #tpu.memory_space<vmem>>, vector<2x256xf32>
    tpu.vector_store %arg5[%c0_29, %c0_30], %74 {strides = array<i32>} : memref<2x256xf32, #tpu.memory_space<vmem>>, vector<2x256xf32>,
    %c0_i32_31 = arith.constant 0 : i32
    %76 = arith.cmpi eq, %arg1, %c0_i32_31 : i32
    %77 = arith.extui %76 : i1 to i32
    %c0_i32_32 = arith.constant 0 : i32
    %78 = arith.cmpi ne, %77, %c0_i32_32 : i32
    scf.if %78 {
      %c0_33 = arith.constant 0 : index
      %c0_34 = arith.constant 0 : index
      %79 = vector.load %arg5[%c0_33, %c0_34] : memref<2x256xf32, #tpu.memory_space<vmem>>, vector<2x256xf32>
      %cst_35 = arith.constant dense<0.000000e+00> : vector<2xf32>
      %80 = vector.multi_reduction <add>, %79, %cst_35 [1] : vector<2x256xf32> to vector<2xf32>
      %81 = vector.shape_cast %80 : vector<2xf32> to vector<2x1xf32>
      %82 = vector.shape_cast %81 : vector<2x1xf32> to vector<1x2x1xf32>
      %c0_36 = arith.constant 0 : index
      %c0_37 = arith.constant 0 : index
      %c0_38 = arith.constant 0 : index
      %83 = vector.load %arg4[%c0_36, %c0_37, %c0_38] : memref<1x2x1xf32, #tpu.memory_space<vmem>>, vector<1x2x1xf32>
      tpu.vector_store %arg4[%c0_36, %c0_37, %c0_38], %82 {strides = array<i32>} : memref<1x2x1xf32, #tpu.memory_space<vmem>>, vector<1x2x1xf32>,
    } else {
    }
    return
  }
  func.func @transform_0(%arg0: i32, %arg1: i32) -> (i32, i32, i32) {
    %c1_i32 = arith.constant 1 : i32
    %0 = arith.muli %arg0, %c1_i32 : i32
    %1 = arith.addi %0, %arg1 : i32
    %c0_i32 = arith.constant 0 : i32
    %2 = arith.minsi %1, %c0_i32 : i32
    %c0_i32_0 = arith.constant 0 : i32
    %c0_i32_1 = arith.constant 0 : i32
    %c0_i32_2 = arith.constant 0 : i32
    return %c0_i32_0, %c0_i32_1, %2 : i32, i32, i32
  }
  func.func @transform_1(%arg0: i32, %arg1: i32) -> (i32, i32, i32) {
    %c1_i32 = arith.constant 1 : i32
    %0 = arith.muli %arg0, %c1_i32 : i32
    %1 = arith.addi %0, %arg1 : i32
    %c0_i32 = arith.constant 0 : i32
    %2 = arith.minsi %1, %c0_i32 : i32
    %c0_i32_0 = arith.constant 0 : i32
    %c0_i32_1 = arith.constant 0 : i32
    %c0_i32_2 = arith.constant 0 : i32
    return %c0_i32_0, %c0_i32_1, %2 : i32, i32, i32
  }
  func.func @transform_2(%arg0: i32, %arg1: i32) -> (i32, i32, i32) {
    %c0_i32 = arith.constant 0 : i32
    %c0_i32_0 = arith.constant 0 : i32
    %c0_i32_1 = arith.constant 0 : i32
    return %arg0, %c0_i32, %c0_i32_0 : i32, i32, i32
  }
}

</mosaic_0001>

<bundles_post_ra>
// kernel: tpu_custom_call.1
= control target key start
LH: loop header
LB: loop body
LE: loop exit
PB: predicated region body
PF: predicated region fallthrough
CT: control target
= control target key end

     0   :  { %7 = vsyncpa [#allocation4], 0  ;;  %s733_s0 = inlined_call_operand.hbm [shape: f32[2,4,256], index: 0, kind: input, shape index: {}]   ;;  %s734_s1 = inlined_call_operand.hbm [shape: f32[2,4,256], index: 1, kind: input, shape index: {}]   ;;  %s735_s2 = inlined_call_operand.vmem [shape: f32[1,2,1], index: 2, kind: output, shape index: {}]  }
   0x1   :  { %8 = vsyncpa [#allocation6], 0  ;;  %s533_s9 = smov [#allocation3]   ;;  %s485_s13 = scalar_lea.hbm %s733_s0, 256 }
   0x2   :  { %s20_s10 = sshll.u32 %s533_s9, 4  ;;  %p486_p0 = scmp.ne.s32.totalorder %s733_s0, %s485_s13  ;;  %s21_s10 = int_to_ptr.vmem [resolvable:$true] %s20_s10 }
   0x3   :  { %p489_p1 = scmp.lt.u32.totalorder %s485_s13, %s733_s0 }
   0x5   :  { %p491_p2 = pnand %p489_p1, %p486_p0 }
   0x7   :  { %494 = shalt.err (!%p491_p2)
}
   0x8   :  { %s495_s18 = scalar_lea.vmem %s21_s10, 256  ;;  %p500_p4 = scmp.lt.s32.totalorder %s21_s10, %s21_s10 }
   0x9   :  { %p496_p3 = scmp.ne.s32.totalorder %s21_s10, %s495_s18  ;;  %p501_p5 = scmp.lt.s32.totalorder %s495_s18, %s495_s18 }
   0xb   :  { %p502_p6 = por %p501_p5, %p500_p4 }
   0xd   :  { %p503_p7 = pnand %p502_p6, %p496_p3 }
   0xf   :  { %506 = shalt.err (!%p503_p7)
}
  0x10   :  { %s534_s19 = smov 128   ;;  %s535_s20 = smov 8  }
  0x11   :  { %26 = dma.hbm_to_vmem [thread:$0]  %s733_s0, 256, %s21_s10, [#allocation4], %s534_s19, %s534_s19, %s535_s20  }
  0x12   :  { %s536_s23 = smov [#allocation5]   ;;  %s507_s27 = scalar_lea.hbm %s734_s1, 256 }
  0x13   :  { %s38_s24 = sshll.u32 %s536_s23, 4  ;;  %p508_p8 = scmp.ne.s32.totalorder %s734_s1, %s507_s27  ;;  %s39_s24 = int_to_ptr.vmem [resolvable:$true] %s38_s24 }
  0x14   :  { %p511_p9 = scmp.lt.u32.totalorder %s507_s27, %s734_s1 }
  0x16   :  { %p513_p10 = pnand %p511_p9, %p508_p8 }
  0x18   :  { %516 = shalt.err (!%p513_p10)
}
  0x19   :  { %s517_s4 = scalar_lea.vmem %s39_s24, 256  ;;  %p522_p12 = scmp.lt.s32.totalorder %s39_s24, %s39_s24 }
  0x1a   :  { %p518_p11 = scmp.ne.s32.totalorder %s39_s24, %s517_s4  ;;  %p523_p13 = scmp.lt.s32.totalorder %s517_s4, %s517_s4 }
  0x1c   :  { %p524_p0 = por %p523_p13, %p522_p12 }
  0x1e   :  { %p525_p1 = pnand %p524_p0, %p518_p11 }
  0x20   :  { %528 = shalt.err (!%p525_p1)
}
  0x21   :  { %44 = dma.hbm_to_vmem [thread:$0]  %s734_s1, 256, %s39_s24, [#allocation6], %s534_s19, %s534_s19, %s535_s20  }
  0x22   :  { %529 = dma.done.wait [#allocation4], 256  }
  0x23   :  { %530 = vsyncadd [#allocation4], 4294967040 }
  0x24   :  { %531 = dma.done.wait [#allocation6], 256  }
  0x25   :  { %532 = vsyncadd [#allocation6], 4294967040  ;;  %v537_v0 = vmov 0.0   ;;  %v64_v1 = vld [vmem:[#allocation3] sm:$0xff]  ;;  %v65_v2 = vld [vmem:[#allocation3 + $0x8] sm:$0xff]  ;;  %vm76_vm0 = vcmask 1043456  }
  0x26   :  { %63 = vst [vmem:[#allocation2] sm:$0xf] %v537_v0  ;;  %v66_v3 = vld [vmem:[#allocation5] sm:$0xff]  ;;  %v67_v4 = vld [vmem:[#allocation5 + $0x8] sm:$0xff]  ;;  %v68_v5 = vmul.f32 %v64_v1, %v64_v1  ;;  %v69_v6 = vmul.f32 %v65_v2, %v65_v2  ;;  %vm235_vm1 = vcmask 1041409  }
  0x27   :  { %v105_v7 = vmul.f32 %v66_v3, %v66_v3  ;;  %v106_v8 = vmul.f32 %v67_v4, %v67_v4  ;;  %v141_v54 = vmul.f32 %v66_v3, %v64_v1  ;;  %v142_v55 = vmul.f32 %v67_v4, %v65_v2 }
  0x28   :  { %v72_v9 = vcombine.high %v68_v5, %v68_v5  ;;  %v73_v10 = vcombine.high %v69_v6, %v69_v6  ;;  %v77_v11 = vsel %vm76_vm0, %v68_v5, 0.0  ;;  %v91_v12 = vsel %vm76_vm0, %v69_v6, 0.0 }
  0x29   :  { %v78_v13 = vrot.slane %v77_v11, 4  ;;  %v92_v14 = vrot.slane %v91_v12, 4  ;;  %v109_v15 = vcombine.high %v105_v7, %v105_v7  ;;  %v110_v16 = vcombine.high %v106_v8, %v106_v8 }
  0x2a   :  { %v84_v17 = vsel %vm76_vm0, %v72_v9, 0.0  ;;  %v98_v18 = vsel %vm76_vm0, %v73_v10, 0.0  ;;  %v113_v19 = vsel %vm76_vm0, %v105_v7, 0.0  ;;  %v127_v20 = vsel %vm76_vm0, %v106_v8, 0.0 }
  0x2b   :  { %v79_v21 = vadd.f32 %v78_v13, %v77_v11  ;;  %v85_v22 = vrot.slane %v84_v17, 4  ;;  %v93_v23 = vadd.f32 %v92_v14, %v91_v12  ;;  %v99_v24 = vrot.slane %v98_v18, 4 }
  0x2c   :  { %v114_v25 = vrot.slane %v113_v19, 4  ;;  %v120_v26 = vsel %vm76_vm0, %v109_v15, 0.0  ;;  %v128_v27 = vrot.slane %v127_v20, 4  ;;  %v134_v28 = vsel %vm76_vm0, %v110_v16, 0.0 }
  0x2d   :  { %v80_v29 = vrot.slane %v79_v21, 2  ;;  %v86_v30 = vadd.f32 %v85_v22, %v84_v17  ;;  %v94_v31 = vrot.slane %v93_v23, 2  ;;  %v100_v32 = vadd.f32 %v99_v24, %v98_v18 }
  0x2e   :  { %v115_v33 = vadd.f32 %v114_v25, %v113_v19  ;;  %v121_v34 = vrot.slane %v120_v26, 4  ;;  %v129_v35 = vadd.f32 %v128_v27, %v127_v20  ;;  %v135_v36 = vrot.slane %v134_v28, 4 }
  0x2f   :  { %v81_v37 = vadd.f32 %v80_v29, %v79_v21  ;;  %v87_v38 = vrot.slane %v86_v30, 2  ;;  %v95_v39 = vadd.f32 %v94_v31, %v93_v23  ;;  %v101_v40 = vrot.slane %v100_v32, 2 }
  0x30   :  { %v116_v41 = vrot.slane %v115_v33, 2  ;;  %v122_v42 = vadd.f32 %v121_v34, %v120_v26  ;;  %v130_v43 = vrot.slane %v129_v35, 2  ;;  %v136_v44 = vadd.f32 %v135_v36, %v134_v28 }
  0x31   :  { %v82_v45 = vrot.slane %v81_v37, 1  ;;  %v88_v46 = vadd.f32 %v87_v38, %v86_v30  ;;  %v102_v47 = vadd.f32 %v101_v40, %v100_v32  ;;  %v96_v53 = vrot.slane %v95_v39, 1 }
  0x32   :  { %v117_v48 = vadd.f32 %v116_v41, %v115_v33  ;;  %v123_v49 = vrot.slane %v122_v42, 2  ;;  %v131_v50 = vadd.f32 %v130_v43, %v129_v35  ;;  %v137_v51 = vrot.slane %v136_v44, 2 }
  0x33   :  { %v89_v52 = vrot.slane %v88_v46, 1  ;;  %v83_v60 = vadd.f32 %v82_v45, %v81_v37  ;;  %v103_v61 = vrot.slane %v102_v47, 1  ;;  %v97_v6 = vadd.f32 %v96_v53, %v95_v39 }
  0x34   :  { %v118_v56 = vrot.slane %v117_v48, 1  ;;  %v124_v57 = vadd.f32 %v123_v49, %v122_v42  ;;  %v132_v58 = vrot.slane %v131_v50, 1  ;;  %v138_v59 = vadd.f32 %v137_v51, %v136_v44 }
  0x35   :  { %v90_v62 = vadd.f32 %v89_v52, %v88_v46  ;;  %v145_v8 = vcombine.high %v141_v54, %v141_v54  ;;  %v146_v10 = vcombine.high %v142_v55, %v142_v55  ;;  %v104_v11 = vadd.f32 %v103_v61, %v102_v47 }
  0x36   :  { %v119_v63 = vadd.f32 %v118_v56, %v117_v48  ;;  %v125_v0 = vrot.slane %v124_v57, 1  ;;  %v139_v5 = vrot.slane %v138_v59, 1  ;;  %v133_v7 = vadd.f32 %v132_v58, %v131_v50 }
  0x37   :  { %v149_v1 = vsel %vm76_vm0, %v141_v54, 0.0  ;;  %v156_v3 = vsel %vm76_vm0, %v145_v8, 0.0  ;;  %v163_v4 = vsel %vm76_vm0, %v142_v55, 0.0  ;;  %v170_v15 = vsel %vm76_vm0, %v146_v10, 0.0 }
  0x38   :  { %v126_v9 = vadd.f32 %v125_v0, %v124_v57  ;;  %v140_v12 = vadd.f32 %v139_v5, %v138_v59  ;;  %v177_v13 = vmul.f32 %v119_v63, %v83_v60  ;;  %v590_v14 = vmul.f32 %v133_v7, %v97_v6 }
  0x39   :  { %v150_v16 = vrot.slane %v149_v1, 4  ;;  %v157_v18 = vrot.slane %v156_v3, 4  ;;  %v164_v19 = vrot.slane %v163_v4, 4  ;;  %v171_v20 = vrot.slane %v170_v15, 4 }
  0x3a   :  { %v178_v2 = vmul.f32 %v126_v9, %v90_v62  ;;  %461 = vrsqrt.f32 %v177_v13  ;;  %v593_v17 = vmul.f32 %v140_v12, %v104_v11  ;;  %vm183_vm2 = vcmp.eq.f32.partialorder %v177_v13, inf }
  0x3b   :  { %v151_v21 = vadd.f32 %v150_v16, %v149_v1  ;;  %v158_v22 = vadd.f32 %v157_v18, %v156_v3  ;;  %v165_v23 = vadd.f32 %v164_v19, %v163_v4  ;;  %v172_v24 = vadd.f32 %v171_v20, %v170_v15 }
  0x3c   :  { %463 = vrsqrt.f32 %v178_v2  ;;  %vm227_vm3 = vcmp.gt.f32.partialorder %v177_v13, 0.0  ;;  %vm228_vm4 = vcmp.gt.f32.partialorder %v178_v2, 0.0  ;;  %vm229_vm5 = vcmp.gt.f32.partialorder %v590_v14, 0.0 }
  0x3d   :  { %465 = vrsqrt.f32 %v590_v14  ;;  %vm230_vm6 = vcmp.gt.f32.partialorder %v593_v17, 0.0  ;;  %v538_v25 = vmov 0   ;;  %v152_v29 = vrot.slane %v151_v21, 2 }
  0x3e   :  { %467 = vrsqrt.f32 %v593_v17  ;;  %v231_v26 = vsel %vm227_vm3, 1, %v538_v25  ;;  %v232_v27 = vsel %vm228_vm4, 1, %v538_v25  ;;  %v186_v30 = vand.u32 2147483648, %v177_v13 }
  0x3f   :  { %v233_v31 = vsel %vm229_vm5, 1, %v538_v25  ;;  %v234_v32 = vsel %vm230_vm6, 1, %v538_v25  ;;  %vm185_vm7 = vcmp.eq.f32.partialorder %v177_v13, 0.0  ;;  %v159_v37 = vrot.slane %v158_v22, 2 }
  0x40   :  { %v604_v34 = vsel %vm235_vm1, %v233_v31, %v231_v26  ;;  %v607_v35 = vsel %vm235_vm1, %v234_v32, %v232_v27  ;;  %v166_v38 = vrot.slane %v165_v23, 2  ;;  %vm190_vm8 = vcmp.eq.f32.partialorder %v178_v2, inf }
  0x41   :  { %v193_v39 = vand.u32 2147483648, %v178_v2  ;;  %v173_v40 = vrot.slane %v172_v24, 2  ;;  %vm192_vm9 = vcmp.eq.f32.partialorder %v178_v2, 0.0  ;;  %v153_v44 = vadd.f32 %v152_v29, %v151_v21 }
  0x42   :  { %vm197_vm10 = vcmp.eq.f32.partialorder %v590_v14, inf  ;;  %v200_v46 = vand.u32 2147483648, %v590_v14  ;;  %vm199_vm11 = vcmp.eq.f32.partialorder %v590_v14, 0.0  ;;  %v160_v50 = vadd.f32 %v159_v37, %v158_v22 }
  0x43   :  { %vm204_vm12 = vcmp.eq.f32.partialorder %v593_v17, inf  ;;  %v207_v52 = vand.u32 2147483648, %v593_v17  ;;  %vm206_vm13 = vcmp.eq.f32.partialorder %v593_v17, 0.0  ;;  %v154_v55 = vrot.slane %v153_v44, 1 }
  0x44   :  { %v462_v28 = vpop.eup %461  ;;  %v167_v56 = vadd.f32 %v166_v38, %v165_v23  ;;  %v161_v59 = vrot.slane %v160_v50, 1  ;;  %v174_v60 = vadd.f32 %v173_v40, %v172_v24 }
  0x45   :  { %v182_v33 = vmul.f32 %v462_v28, %v177_v13  ;;  %v155_v62 = vadd.f32 %v154_v55, %v153_v44 }
  0x46   :  { %v464_v36 = vpop.eup %463  ;;  %v168_v63 = vrot.slane %v167_v56, 1  ;;  %v162_v0 = vadd.f32 %v161_v59, %v160_v50  ;;  %v175_v5 = vrot.slane %v174_v60, 1 }
  0x47   :  { %v184_v41 = vsel %vm183_vm2, %v177_v13, %v182_v33  ;;  %v189_v42 = vmul.f32 %v464_v36, %v178_v2  ;;  %v466_v43 = vpop.eup %465 }
  0x48   :  { %v187_v45 = vsel %vm185_vm7, %v186_v30, %v184_v41  ;;  %v196_v48 = vmul.f32 %v466_v43, %v590_v14  ;;  %v468_v49 = vpop.eup %467  ;;  %v169_v7 = vadd.f32 %v168_v63, %v167_v56  ;;  %v176_v10 = vadd.f32 %v175_v5, %v174_v60 }
  0x49   :  { %v191_v47 = vsel %vm190_vm8, %v178_v2, %v189_v42  ;;  %469 = vrcp.f32 %v187_v45  ;;  %v203_v54 = vmul.f32 %v468_v49, %v593_v17 }
  0x4a   :  { %v194_v51 = vsel %vm192_vm9, %v193_v39, %v191_v47  ;;  %v198_v53 = vsel %vm197_vm10, %v590_v14, %v196_v48 }
  0x4b   :  { %471 = vrcp.f32 %v194_v51  ;;  %v201_v57 = vsel %vm199_vm11, %v200_v46, %v198_v53  ;;  %v205_v58 = vsel %vm204_vm12, %v593_v17, %v203_v54 }
  0x4c   :  { %473 = vrcp.f32 %v201_v57  ;;  %v208_v61 = vsel %vm206_vm13, %v207_v52, %v205_v58 }
  0x4d   :  { %475 = vrcp.f32 %v208_v61 }
  0x53   :  { %v470_v6 = vpop.eup %469 }
  0x54   :  { %v620_v8 = vmul.f32 %v470_v6, %v155_v62 }
  0x55   :  { %v472_v9 = vpop.eup %471 }
  0x56   :  { %v622_v11 = vmul.f32 %v472_v9, %v162_v0  ;;  %v625_v12 = vclamps-f32 %v620_v8, 1.0  ;;  %v474_v13 = vpop.eup %473 }
  0x57   :  { %v627_v1 = vmul.f32 %v474_v13, %v169_v7  ;;  %v476_v3 = vpop.eup %475 }
  0x58   :  { %v630_v2 = vclamps-f32 %v622_v11, 1.0  ;;  %v268_v4 = vand.u32 2147483647, %v625_v12  ;;  %v633_v14 = vmul.f32 %v476_v3, %v176_v10 }
  0x59   :  { %v636_v15 = vclamps-f32 %v627_v1, 1.0 }
  0x5a   :  { %v269_v16 = vand.u32 2147483647, %v630_v2  ;;  %v276_v17 = vsub.f32 1.0, %v268_v4  ;;  %v640_v18 = vclamps-f32 %v633_v14, 1.0  ;;  %vm644_vm14 = vcmp.gt.f32.partialorder %v268_v4, 0.5 }
  0x5b   :  { %v270_v19 = vand.u32 2147483647, %v636_v15 }
  0x5c   :  { %v277_v20 = vsub.f32 1.0, %v269_v16  ;;  %v280_v21 = vmul.f32 0.5, %v276_v17  ;;  %v271_v22 = vand.u32 2147483647, %v640_v18  ;;  %vm648_vm15 = vcmp.gt.f32.partialorder %v269_v16, 0.5 }
  0x5d   :  { %v278_v23 = vsub.f32 1.0, %v270_v19  ;;  %vm652_vm4 = vcmp.gt.f32.partialorder %v270_v19, 0.5  ;;  %v242_v17 = vand.u32 2147483647, %v620_v8 }
  0x5e   :  { %v281_v24 = vmul.f32 0.5, %v277_v20  ;;  %v279_v26 = vsub.f32 1.0, %v271_v22  ;;  %v284_v27 = vmax.f32 %v280_v21, 0.0  ;;  %vm661_vm10 = vcmp.gt.f32.partialorder %v271_v22, 0.5 }
  0x5f   :  { %v282_v28 = vmul.f32 0.5, %v278_v23  ;;  %vm246_vm11 = vcmp.le.f32.partialorder %v242_v17, 1.0 }
  0x60   :  { %v285_v29 = vmax.f32 %v281_v24, 0.0  ;;  %v283_v30 = vmul.f32 0.5, %v279_v26  ;;  %477 = vrsqrt.f32 %v284_v27  ;;  %vm290_vm0 = vcmp.eq.f32.partialorder %v284_v27, inf }
  0x61   :  { %v286_v31 = vmax.f32 %v282_v28, 0.0  ;;  %v293_v38 = vand.u32 2147483648, %v284_v27  ;;  %vm292_vm2 = vcmp.eq.f32.partialorder %v284_v27, 0.0  ;;  %v244_v26 = vand.u32 2147483647, %v627_v1 }
  0x62   :  { %479 = vrsqrt.f32 %v285_v29  ;;  %v287_v32 = vmax.f32 %v283_v30, 0.0  ;;  %vm297_vm3 = vcmp.eq.f32.partialorder %v285_v29, inf  ;;  %v300_v41 = vand.u32 2147483648, %v285_v29 }
  0x63   :  { %481 = vrsqrt.f32 %v286_v31  ;;  %vm299_vm5 = vcmp.eq.f32.partialorder %v285_v29, 0.0  ;;  %vm304_vm6 = vcmp.eq.f32.partialorder %v286_v31, inf  ;;  %vm306_vm7 = vcmp.eq.f32.partialorder %v286_v31, 0.0 }
  0x64   :  { %483 = vrsqrt.f32 %v287_v32  ;;  %v307_v46 = vand.u32 2147483648, %v286_v31  ;;  %vm311_vm8 = vcmp.eq.f32.partialorder %v287_v32, inf  ;;  %v314_v51 = vand.u32 2147483648, %v287_v32 }
  0x65   :  { %vm313_vm9 = vcmp.eq.f32.partialorder %v287_v32, 0.0  ;;  %vm248_vm12 = vcmp.le.f32.partialorder %v244_v26, 1.0  ;;  %v250_v1 = vsel %vm246_vm11, 1, %v538_v25  ;;  %vm379_vm11 = vcmp.lt.f32.partialorder %v640_v18, 0.0 }
  0x6a   :  { %v478_v33 = vpop.eup %477 }
  0x6b   :  { %v289_v40 = vmul.f32 %v478_v33, %v284_v27 }
  0x6c   :  { %v480_v39 = vpop.eup %479 }
  0x6d   :  { %v296_v43 = vmul.f32 %v480_v39, %v285_v29  ;;  %v482_v44 = vpop.eup %481  ;;  %v291_v45 = vsel %vm290_vm0, %v284_v27, %v289_v40 }
  0x6e   :  { %v484_v47 = vpop.eup %483  ;;  %v294_v48 = vsel %vm292_vm2, %v293_v38, %v291_v45  ;;  %v303_v50 = vmul.f32 %v482_v44, %v286_v31  ;;  %vm238_vm2 = vcmp.ne.s32.totalorder %v604_v34, 0 }
  0x6f   :  { %v298_v49 = vsel %vm297_vm3, %v285_v29, %v296_v43  ;;  %v310_v53 = vmul.f32 %v484_v47, %v287_v32  ;;  %v659_v54 = vsel %vm644_vm14, %v294_v48, %v625_v12  ;;  %v243_v29 = vand.u32 2147483647, %v622_v11 }
  0x70   :  { %v301_v52 = vsel %vm299_vm5, %v300_v41, %v298_v49  ;;  %v305_v56 = vsel %vm304_vm6, %v286_v31, %v303_v50  ;;  %v320_v58 = vmul.f32 %v659_v54, %v659_v54  ;;  %vm239_vm3 = vcmp.ne.s32.totalorder %v607_v35, 0 }
  0x71   :  { %v669_v57 = vsel %vm648_vm15, %v301_v52, %v630_v2  ;;  %v308_v59 = vsel %vm306_vm7, %v307_v46, %v305_v56  ;;  %v312_v60 = vsel %vm311_vm8, %v287_v32, %v310_v53  ;;  %v245_v32 = vand.u32 2147483647, %v633_v14 }
  0x72   :  { %v321_v61 = vmul.f32 %v669_v57, %v669_v57  ;;  %v315_v62 = vsel %vm313_vm9, %v314_v51, %v312_v60  ;;  %v679_v63 = vsel %vm652_vm4, %v308_v59, %v636_v15  ;;  %v324_v0 = vmul.f32 0.0421632, %v320_v58 }
  0x73   :  { %v684_v5 = vsel %vm661_vm10, %v315_v62, %v640_v18  ;;  %v322_v6 = vmul.f32 %v679_v63, %v679_v63  ;;  %v356_v43 = vmul.f32 %v320_v58, %v659_v54  ;;  %vm247_vm13 = vcmp.le.f32.partialorder %v243_v29, 1.0 }
  0x74   :  { %v325_v7 = vmul.f32 0.0421632, %v321_v61  ;;  %v323_v9 = vmul.f32 %v684_v5, %v684_v5  ;;  %v328_v10 = vadd.f32 0.024181312, %v324_v0  ;;  %v357_v11 = vmul.f32 %v321_v61, %v669_v57 }
  0x75   :  { %v326_v13 = vmul.f32 0.0421632, %v322_v6  ;;  %vm249_vm0 = vcmp.le.f32.partialorder %v245_v32, 1.0  ;;  %v252_v14 = vsel %vm248_vm12, 1, %v538_v25  ;;  %v358_v50 = vmul.f32 %v322_v6, %v679_v63 }
  0x76   :  { %v329_v3 = vadd.f32 0.024181312, %v325_v7  ;;  %v327_v4 = vmul.f32 0.0421632, %v323_v9  ;;  %v332_v16 = vmul.f32 %v328_v10, %v320_v58  ;;  %v359_v52 = vmul.f32 %v323_v9, %v684_v5 }
  0x77   :  { %v330_v19 = vadd.f32 0.024181312, %v326_v13  ;;  %v251_v56 = vsel %vm247_vm13, 1, %v538_v25  ;;  %v409_v7 = vlaneseq  ;;  %v539_v13 = vmov 1983009808  }
  0x78   :  { %v333_v20 = vmul.f32 %v329_v3, %v321_v61  ;;  %v331_v21 = vadd.f32 0.024181312, %v327_v4  ;;  %v336_v22 = vadd.f32 0.045470025, %v332_v16  ;;  %vm376_vm6 = vcmp.lt.f32.partialorder %v625_v12, 0.0 }
  0x79   :  { %v334_v23 = vmul.f32 %v330_v19, %v322_v6  ;;  %vm377_vm7 = vcmp.lt.f32.partialorder %v630_v2, 0.0  ;;  %vm378_vm9 = vcmp.lt.f32.partialorder %v636_v15, 0.0  ;;  %v410_v29 = vshrl.u32 %v409_v7, 7 }
  0x7a   :  { %v337_v24 = vadd.f32 0.045470025, %v333_v20  ;;  %v335_v27 = vmul.f32 %v331_v21, %v323_v9  ;;  %v340_v28 = vmul.f32 %v336_v22, %v320_v58 }
  0x7b   :  { %v338_v30 = vadd.f32 0.045470025, %v334_v23 }
  0x7c   :  { %v341_v31 = vmul.f32 %v337_v24, %v321_v61  ;;  %v339_v33 = vadd.f32 0.045470025, %v335_v27  ;;  %v344_v38 = vadd.f32 0.074953005, %v340_v28 }
  0x7d   :  { %v342_v8 = vmul.f32 %v338_v30, %v322_v6 }
  0x7e   :  { %v345_v39 = vadd.f32 0.074953005, %v341_v31  ;;  %v343_v40 = vmul.f32 %v339_v33, %v323_v9  ;;  %v348_v41 = vmul.f32 %v344_v38, %v320_v58  ;;  %v253_v58 = vsel %vm249_vm0, 1, %v538_v25 }
  0x7f   :  { %v346_v44 = vadd.f32 0.074953005, %v342_v8  ;;  %v255_v3 = vsel %vm235_vm1, %v253_v58, %v251_v56 }
  0x80   :  { %v349_v45 = vmul.f32 %v345_v39, %v321_v61  ;;  %v347_v46 = vadd.f32 0.074953005, %v343_v40  ;;  %v352_v47 = vadd.f32 0.16666752, %v348_v41  ;;  %v254_v61 = vsel %vm235_vm1, %v252_v14, %v250_v1  ;;  %v392_v39 = vld [vmem:[#allocation2] sm:$0xf] }
  0x81   :  { %v350_v48 = vmul.f32 %v346_v44, %v322_v6  ;;  %vm256_vm5 = vcmp.ne.s32.totalorder %v254_v61, 0  ;;  %vm257_vm8 = vcmp.ne.s32.totalorder %v255_v3, 0 }
  0x82   :  { %v353_v49 = vadd.f32 0.16666752, %v349_v45  ;;  %v351_v51 = vmul.f32 %v347_v46, %v323_v9  ;;  %v360_v53 = vmul.f32 %v356_v43, %v352_v47  ;;  %v407_v9 = vunpack.c.l.s4 %v539_v13  ;;  %vm258_vm12 = vmand %vm238_vm2, %vm256_vm5 }
  0x83   :  { %v354_v59 = vadd.f32 0.16666752, %v350_v48  ;;  %vm259_vm13 = vmand %vm239_vm3, %vm257_vm8 }
  0x84   :  { %v361_v60 = vmul.f32 %v357_v11, %v353_v49  ;;  %v355_v62 = vadd.f32 0.16666752, %v351_v51  ;;  %v364_v0 = vadd.f32 %v360_v53, %v659_v54  ;;  %v408_v2 = vunpack.c.0.s8 %v407_v9 }
  0x85   :  { %v362_v10 = vmul.f32 %v358_v50, %v354_v59 }
  0x86   :  { %v365_v6 = vadd.f32 %v361_v60, %v669_v57  ;;  %v363_v25 = vmul.f32 %v359_v52, %v355_v62  ;;  %v372_v4 = vmul.f32 2.0, %v364_v0  ;;  %v368_v19 = vsub.f32 1.5707964, %v364_v0 }
  0x87   :  { %v366_v16 = vadd.f32 %v362_v10, %v679_v63  ;;  %v411_v38 = vsub.s32 %v408_v2, %v410_v29 }
  0x88   :  { %v373_v17 = vmul.f32 2.0, %v365_v6  ;;  %v367_v54 = vadd.f32 %v363_v25, %v684_v5  ;;  %v380_v57 = vsub.f32 3.1415927, %v372_v4  ;;  %v369_v20 = vsub.f32 1.5707964, %v365_v6 }
  0x89   :  { %v374_v21 = vmul.f32 2.0, %v366_v16  ;;  %v370_v23 = vsub.f32 1.5707964, %v366_v16 }
  0x8a   :  { %v381_v22 = vsub.f32 3.1415927, %v373_v17  ;;  %v375_v24 = vmul.f32 2.0, %v367_v54  ;;  %v384_v26 = vsel %vm376_vm6, %v380_v57, %v372_v4  ;;  %v371_v27 = vsub.f32 1.5707964, %v367_v54 }
  0x8b   :  { %v382_v63 = vsub.f32 3.1415927, %v374_v21  ;;  %v388_v5 = vsel %vm644_vm14, %v384_v26, %v368_v19  ;;  %vm431_vm14 = vcmask 1041408  }
  0x8c   :  { %v385_v12 = vsel %vm377_vm7, %v381_v22, %v373_v17  ;;  %v383_v28 = vsub.f32 3.1415927, %v375_v24 }
  0x8d   :  { %v386_v30 = vsel %vm378_vm9, %v382_v63, %v374_v21  ;;  %v389_v15 = vsel %vm648_vm15, %v385_v12, %v369_v20  ;;  %vm437_vm15 = vcmask 1024  }
  0x8e   :  { %v387_v18 = vsel %vm379_vm11, %v383_v28, %v375_v24  ;;  %v390_v31 = vsel %vm652_vm4, %v386_v30, %v370_v23 }
  0x8f   :  { %v391_v36 = vsel %vm661_vm10, %v387_v18, %v371_v27  ;;  %v397_v32 = vsel %vm235_vm1, %v390_v31, %v388_v5 }
  0x90   :  { %v398_v34 = vsel %vm235_vm1, %v391_v36, %v389_v15  ;;  %v401_v33 = vsel %vm258_vm12, %v397_v32, 0.0 }
  0x91   :  { %v402_v8 = vsel %vm259_vm13, %v398_v34, 0.0 }
  0x92   :  { %v405_v37 = vcombine.low %v401_v33, %v402_v8 }
  0x94   :  { %v412_v40 = vrot.slane %v405_v37, %v411_v38 }
  0x96   :  { %v414_v41 = vadd.f32 %v412_v40, %v392_v39 }
  0x98   :  { %415 = vst [vmem:[#allocation2] sm:$0xf] %v414_v41 }
  0x9f   :  { %v453_v35 = vld.sshfl [vmem:[#allocation2] sm:$0x33 pattern:$0x76325410] }
  0xa0   :  { %v428_v43 = vcombine.high %v453_v35, %v453_v35  ;;  %v432_v42 = vsel %vm431_vm14, %v453_v35, 0.0 }
  0xa2   :  { %v433_v1 = vsel %vm431_vm14, %v428_v43, 0.0 }
  0xa3   :  { %v434_v44 = vadd.f32 %v433_v1, %v432_v42 }
  0xa5   :  { %435 = vadd.xlane.f32.xlu0 %v434_v44 }
 0x132   :  { %v436_v55 = vpop.xlane.xlu0 %435 }
 0x133   :  { %438 = vst.msk [vmem:[%s735_s2] sm:$0x3] %vm437_vm15, %v436_v55 }
 0x134   :  { %443 = vsyncpa [#allocation4], 1 }
 0x135   :  { %444 = vsyncpa [#allocation6], 1 }

</bundles_post_ra>
